<compile_context>
chip_gen: v6e
topology: v6e:2x2x1
jax: 0.10.0
libtpu: 0.0.40
codegen_flags: <defaults>
</compile_context>

<pallas_src>
import jax
import jax.numpy as jnp
import numpy as np
from jax.experimental import pallas as pl
from jax.experimental.pallas import tpu as pltpu


# ---------------------------------------------------------------------------
# Kernels (two static variants, selected at trace time on channel depth).
# ---------------------------------------------------------------------------

def _spatial_attn_kernel_vpu(x_ref, w_ref, o_ref):
    # x_ref: (C, TL) tile of one image — channels on sublanes, pixels on lanes.
    # w_ref: (C, 1)  f32 squeeze weights, broadcast over the pixel/lane axis.
    x = x_ref[...]                                                   # native dtype
    w = w_ref[...]                                                   # (C, 1) f32
    # 1x1 conv == per-pixel channel reduction; accumulate in f32 for accuracy.
    z = jnp.sum(x.astype(jnp.float32) * w, axis=0, keepdims=True)    # (1, TL)
    z = jax.nn.sigmoid(z)                                            # EUP
    o_ref[...] = (x * z.astype(x.dtype)).astype(o_ref.dtype)


def _spatial_attn_kernel_mxu(x_ref, w_ref, o_ref):
    # Deep-channel variant: push the channel reduction onto the MXU so the
    # vector slots only see the final broadcast-multiply, and no f32 copy of
    # the whole tile is materialized for bf16 inputs.
    # x_ref: (C, TL);  w_ref: (1, C) in x.dtype.
    x = x_ref[...]
    w = w_ref[...]
    z = jnp.dot(w, x, preferred_element_type=jnp.float32)            # (1, TL) on MXU
    z = jax.nn.sigmoid(z)                                            # EUP
    o_ref[...] = (x * z.astype(x.dtype)).astype(o_ref.dtype)


# ---------------------------------------------------------------------------
# Tiling / wrapper
# ---------------------------------------------------------------------------

# Per grid step we hold a double-buffered (C, TL) input tile and a
# double-buffered (C, TL) output tile.  Keep their total under a conservative
# budget so the kernel fits scoped VMEM on every generation
# (v5e/v6e: 128 MiB physical, v7x: 64 MiB physical / 32 MiB default scoped).
_TILE_VMEM_BUDGET = 24 * 1024 * 1024   # bytes for double-buffered tiles
_VMEM_LIMIT_BYTES = 48 * 1024 * 1024   # explicit scoped-VMEM limit (safe on v5e/v6e/v7x)
_MXU_MIN_CHANNELS = 128                # use the MXU reduction for deep channel counts


def _pick_pixel_tile(hw, c, itemsize):
    """Largest lane-dense pixel tile TL (multiple of 128) that fits the budget."""
    per_lane_bytes = 2 * 2 * c * itemsize          # (in + out) x double-buffer
    tl = _TILE_VMEM_BUDGET // per_lane_bytes
    if tl >= hw or hw <= 128:
        return hw                                  # whole spatial extent in one block
    return max(128, (tl // 128) * 128)             # cdiv grid masks the ragged tail


def spatial_attention_2d(x_nchw, weight):
    """x_nchw: (N, C, H, W); weight: (1, C, 1, 1) = Conv2d(C, 1, 1, bias=False).weight."""
    N, C, H, W = x_nchw.shape
    HW = H * W
    x_flat = x_nchw.reshape(N, C, HW)              # free view, no HBM transpose

    use_mxu = C >= _MXU_MIN_CHANNELS
    if use_mxu:
        kernel = _spatial_attn_kernel_mxu
        w_arg = weight.reshape(1, C).astype(x_flat.dtype)            # (1, C) row for MXU
        w_spec = pl.BlockSpec((1, C), lambda n, t: (0, 0))
    else:
        kernel = _spatial_attn_kernel_vpu
        w_arg = weight.reshape(C, 1).astype(jnp.float32)             # (C, 1) column
        w_spec = pl.BlockSpec((C, 1), lambda n, t: (0, 0))

    TL = _pick_pixel_tile(HW, C, x_flat.dtype.itemsize)
    grid = (N, pl.cdiv(HW, TL))                    # 2-D fully parallel grid (megacore)

    out_flat = pl.pallas_call(
        kernel,
        out_shape=jax.ShapeDtypeStruct((N, C, HW), x_flat.dtype),
        grid_spec=pltpu.PrefetchScalarGridSpec(
            num_scalar_prefetch=0,
            grid=grid,
            in_specs=[
                # (None, C, TL): batch dim squeezed; kernel sees a (C, TL) tile.
                pl.BlockSpec((None, C, TL), lambda n, t: (n, 0, t)),
                # squeeze weight, same block every grid step (fetched once).
                w_spec,
            ],
            out_specs=pl.BlockSpec((None, C, TL), lambda n, t: (n, 0, t)),
        ),
        compiler_params=pltpu.CompilerParams(
            dimension_semantics=("parallel", "parallel"),
            vmem_limit_bytes=_VMEM_LIMIT_BYTES,
        ),
    )(x_flat, w_arg)

    # TODO(synk): for late CNN stages with H*W < 128 and very deep C, a
    # channels-on-lanes layout would be denser, but it needs an HBM transpose
    # that costs more than the lane padding it removes at these sizes.
    return out_flat.reshape(N, C, H, W)


def _reference(x_nchw, weight):
    # Pure-JAX reference of the PyTorch forward.
    w = weight.reshape(1, -1, 1, 1)
    z = jnp.sum(x_nchw * w, axis=1, keepdims=True)   # 1x1 conv (C -> 1), no bias
    z = jax.nn.sigmoid(z)
    return x_nchw * z


if __name__ == "__main__":
    key = jax.random.PRNGKey(0)

    # --- small-channel path (VPU reduction), shapes implied by the module ---
    kx, kw, key = jax.random.split(key, 3)
    N, C, H, W = 2, 4, 16, 16
    x = jax.random.normal(kx, (N, C, H, W), dtype=jnp.float32)
    weight = jax.random.normal(kw, (1, C, 1, 1), dtype=jnp.float32) * 0.1

    out = jax.block_until_ready(spatial_attention_2d(x, weight))
    np.testing.assert_allclose(
        np.asarray(out), np.asarray(_reference(x, weight)), rtol=1e-5, atol=1e-5)

    # --- deep-channel path (MXU reduction) ---
    kx2, kw2, key = jax.random.split(key, 3)
    N2, C2, H2, W2 = 2, 256, 8, 16
    x2 = jax.random.normal(kx2, (N2, C2, H2, W2), dtype=jnp.float32)
    weight2 = jax.random.normal(kw2, (1, C2, 1, 1), dtype=jnp.float32) * 0.05

    out2 = jax.block_until_ready(spatial_attention_2d(x2, weight2))
    np.testing.assert_allclose(
        np.asarray(out2), np.asarray(_reference(x2, weight2)), rtol=1e-4, atol=1e-4)

    print("KERNEL_OK")
</pallas_src>

<mosaic_0001>
module attributes {stable_mosaic.version = 11 : i64} {
  func.func @_spatial_attn_kernel_vpu(%arg0: i32, %arg1: i32, %arg2: memref<1x4x256xf32, #tpu.memory_space<vmem>>, %arg3: memref<4x1xf32, #tpu.memory_space<vmem>>, %arg4: memref<1x4x256xf32, #tpu.memory_space<vmem>>) attributes {dimension_semantics = [#tpu.dimension_semantics<parallel>, #tpu.dimension_semantics<parallel>], iteration_bounds = array<i64: 2, 1>, scalar_prefetch = 0 : i64, scratch_operands = 0 : i64, tpu.core_type = #tpu.core_type<tc>, window_params = [{transform_indices = @transform_0, window_bounds = array<i64: 1, 4, 256>}, {pipeline_mode = #tpu.pipeline_mode<synchronous>, transform_indices = @transform_1, window_bounds = array<i64: 4, 1>}, {transform_indices = @transform_2, window_bounds = array<i64: 1, 4, 256>}]} {
    %c0 = arith.constant 0 : index
    %c0_0 = arith.constant 0 : index
    %c0_1 = arith.constant 0 : index
    %0 = vector.load %arg2[%c0, %c0_0, %c0_1] : memref<1x4x256xf32, #tpu.memory_space<vmem>>, vector<1x4x256xf32>
    %1 = vector.shape_cast %0 : vector<1x4x256xf32> to vector<4x256xf32>
    %c0_2 = arith.constant 0 : index
    %c0_3 = arith.constant 0 : index
    %2 = vector.load %arg3[%c0_2, %c0_3] : memref<4x1xf32, #tpu.memory_space<vmem>>, vector<4x1xf32>
    %3 = vector.broadcast %2 : vector<4x1xf32> to vector<4x256xf32>
    %4 = arith.mulf %1, %3 : vector<4x256xf32>
    %cst = arith.constant dense<0.000000e+00> : vector<256xf32>
    %5 = vector.multi_reduction <add>, %4, %cst [0] : vector<4x256xf32> to vector<256xf32>
    %6 = vector.shape_cast %5 : vector<256xf32> to vector<1x256xf32>
    %7 = arith.negf %6 : vector<1x256xf32>
    %8 = math.exp %7 : vector<1x256xf32>
    %cst_4 = arith.constant 1.000000e+00 : f32
    %9 = vector.broadcast %cst_4 : f32 to vector<1x256xf32>
    %10 = arith.addf %9, %8 : vector<1x256xf32>
    %11 = arith.divf %9, %10 : vector<1x256xf32>
    %12 = vector.broadcast %11 : vector<1x256xf32> to vector<4x256xf32>
    %13 = arith.mulf %1, %12 : vector<4x256xf32>
    %c0_5 = arith.constant 0 : index
    %c0_6 = arith.constant 0 : index
    %c0_7 = arith.constant 0 : index
    %14 = vector.load %arg4[%c0_5, %c0_6, %c0_7] : memref<1x4x256xf32, #tpu.memory_space<vmem>>, vector<1x4x256xf32>
    %15 = vector.shape_cast %14 : vector<1x4x256xf32> to vector<4x256xf32>
    %16 = vector.shape_cast %13 : vector<4x256xf32> to vector<1x4x256xf32>
    tpu.vector_store %arg4[%c0_5, %c0_6, %c0_7], %16 {strides = array<i32>} : memref<1x4x256xf32, #tpu.memory_space<vmem>>, vector<1x4x256xf32>,
    return
  }
  func.func @transform_0(%arg0: i32, %arg1: i32) -> (i32, i32, i32) {
    %c0_i32 = arith.constant 0 : i32
    %c0_i32_0 = arith.constant 0 : i32
    return %arg0, %c0_i32, %arg1 : i32, i32, i32
  }
  func.func @transform_1(%arg0: i32, %arg1: i32) -> (i32, i32) {
    %c0_i32 = arith.constant 0 : i32
    %c0_i32_0 = arith.constant 0 : i32
    %c0_i32_1 = arith.constant 0 : i32
    return %c0_i32, %c0_i32_0 : i32, i32
  }
  func.func @transform_2(%arg0: i32, %arg1: i32) -> (i32, i32, i32) {
    %c0_i32 = arith.constant 0 : i32
    %c0_i32_0 = arith.constant 0 : i32
    return %arg0, %c0_i32, %arg1 : i32, i32, i32
  }
}

</mosaic_0001>

<bundles_post_ra>
// kernel: tpu_custom_call.1
= control target key start
LH: loop header
LB: loop body
LE: loop exit
PB: predicated region body
PF: predicated region fallthrough
CT: control target
= control target key end

     0   :  { %7 = vsyncpa [#allocation3], 0  ;;  %s694_s0 = inlined_call_operand.hbm [shape: f32[2,4,256], index: 0, kind: input, shape index: {}]   ;;  %s695_s1 = inlined_call_operand.vmem [shape: f32[4,1], index: 1, kind: input, shape index: {}]   ;;  %s696_s2 = inlined_call_operand.hbm [shape: f32[2,4,256], index: 2, kind: output, shape index: {}]  }
   0x1   :  { %9 = vsyncpa [#allocation3 + $0x1], 0 }
   0x2   :  { %10 = vsyncpa [#allocation4], 0 }
   0x3   :  { %12 = vsyncpa [#allocation4 + $0x1], 0  ;;  %s553_s9 = smov 0   ;;  %s555_s10 = smov 0  }
   0x4   :  { %s557_s11 = smov 0   ;;  %s559_s12 = smov 0  }
   0x5   :  { %s561_s13 = smov 0   ;;  %s563_s14 = smov 0  }
   0x6 LB: > { %s332_s15 = sadd.s32 4294967295, %s532_s14   ;;  %s333_s16 = sadd.s32 4294967294, %s532_s14   ;;  %s532_s14 = sphi %s563_s14, %s18_s14   ;;  %s528_s13 = sphi %s561_s13, %s708_s13   ;;  %s524_s12 = sphi %s559_s12, %s707_s12   ;;  %s520_s11 = sphi %s557_s11, %s706_s11   ;;  %s516_s10 = sphi %s555_s10, %s705_s10   ;;  %s512_s9 = sphi %s553_s9, %s704_s9  }
   0x7   : > { %s30_s17 = sadd.s32 1, %s528_s13  ;;  %s39_s18 = sadd.s32 1, %s520_s11 }
   0x8   : > { %p32_p0 = scmp.ge.s32.totalorder %s30_s17, 2  ;;  %p46_p1 = scmp.ne.s32.totalorder %s520_s11, %s516_s10 }
   0x9   : > { %p47_p2 = scmp.eq.s32.totalorder %s532_s14, 0  ;;  %p52_p3 = scmp.ne.s32.totalorder %s516_s10, %s512_s9 }
   0xa   : > { %s710_s17 = smov (%p32_p0, %s30_s17), 0  ;;  %p53_p5 = scmp.eq.s32.totalorder %s332_s15, 0 }
   0xb   : > { %p594_p4 = por %p47_p2, %p46_p1  ;;  %s34_s20 = ssub.s32 %s528_s13, %s710_s17 }
   0xc   : > { %p99_p6 = scmp.eq.s32.totalorder %s332_s15, 1  ;;  %p37_p7 = scmp.eq.s32.totalorder %s34_s20, 0 }
   0xd   : > { %p600_p8 = por %p53_p5, %p52_p3  ;;  %p105_p10 = scmp.eq.s32.totalorder %s333_s16, 1 }
   0xe   : > { %p604_p9 = por %p99_p6, %p46_p1  ;;  %p363_p13 = scmp.lt.s32.totalorder %s532_s14, 2 }
   0xf   : > { %s609_s23 = scalar_select %p37_p7, %s520_s11, %s39_s18  }
  0x10   : > { %p611_p11 = por %p105_p10, %p52_p3  ;;  %s128_s25 = sand.u32 1, %s520_s11  }
  0x11   : > { %s336_s26 = sshll.u32 %s128_s25, 3  ;;  %s349_s27 = sshll.u32 %s528_s13, 7 }
  0x12   : > { %s700_s24 = scalar_select %p611_p11, 1, 0 }
  0x13   : > { %s140_s30 = scalar_lea.hbm %s694_s0, %s349_s27  ;;  %s132_s3 = scalar_lea.vmem [#allocation2], %s336_s26 }
  0x14   : > { %s142_s4 = sshll.u32 %s132_s3, 4  ;;  %p624_p0 = pnand %p363_p13, %p594_p4  ;;  %s143_s4 = int_to_ptr.vmem [resolvable:$true] %s142_s4 }
  0x15   : > { %p339_p1 = scmp.ge.s32.totalorder %s532_s14, 1  ;;  %p147_p2 = scmp.lt.s32.totalorder %s532_s14, 3 }
  0x16   : > { %s129_s6 = scalar_lea.sflag [#allocation3], %s128_s25  ;;  %p426_p3 = pneg %p624_p0 }
  0x17   : > { %s437_s7 = scalar_lea.vmem %s143_s4, 128  ;;  %s534_s8 = smov [#allocation2]  }
  0x18   : > { %p438_p5 = scmp.ne.s32.totalorder %s143_s4, %s437_s7  ;;  %s442_s15 = sshll.u32 %s534_s8, 4  ;;  %s443_s15 = int_to_ptr.vmem [resolvable:$false] %s442_s15 }
  0x19   : > { %s444_s16 = scalar_lea.vmem %s443_s15, 256  ;;  %p445_p10 = scmp.lt.s32.totalorder %s143_s4, %s443_s15 }
  0x1a   : > { %p440_p6 = pnand %p438_p5, %p426_p3  ;;  %p446_p12 = scmp.lt.s32.totalorder %s444_s16, %s437_s7 }
  0x1c   : > { %p441_p7 = pneg %p440_p6  ;;  %p447_p4 = por %p446_p12, %p445_p10 }
  0x1e   : > { %p448_p13 = pnand %p447_p4, %p441_p7 }
  0x20   : > { %451 = shalt.err (!%p448_p13)
}
  0x21   : > { %358 = dma.hbm_to_vmem [thread:$0]  (!%p624_p0), %s140_s30, 128, %s143_s4, %s129_s6  }
  0x22   : > { %p148_p11 = pnand %p339_p1, %p147_p2 }
  0x23   : > { %s639_s18 = sand.u32 (!%p148_p11), 1, %s516_s10  }
  0x24   : > { %151 = sbr.rel (%p148_p11) target bundleno = 236 (0xec), region = 28  ;;  %s340_s19 = sshll.u32 (!%p148_p11), %s639_s18, 3 }
  0x25   : > { %s154_s20 = scalar_lea.sflag (!%p148_p11), [#allocation3], %s639_s18  ;;  %s157_s25 = scalar_lea.vmem (!%p148_p11), [#allocation2], %s340_s19 }
  0x29   : > { %503 = dma.done.wait (%p600_p8), %s154_s20, 128  }
  0x2a   : > { %505 = vsyncadd (%p600_p8), %s154_s20, 4294967168  ;;  %v535_v0 = vmov 0   ;;  %v181_v1 = vld [vmem:[%s695_s1] sm:$0xf]  ;;  %v536_v2 = vmov 839922192   ;;  %v189_v4 = vlaneseq }
  0x2b   : > { %415 = vset.pattern.permute.xlu0 %v535_v0  ;;  %v187_v3 = vunpack.c.l.s4 %v536_v2  ;;  %v180_v9 = vld [vmem:[%s157_s25] sm:$0xff]  ;;  %vm198_vm0 = vcmask 1043456   ;;  %s350_s21 = sshll.u32 %s524_s12, 7  ;;  %s177_s28 = scalar_lea.vmem [#allocation5], %s340_s19 }
  0x2c   : > { %184 = vperm.xlu0 %415, %v181_v1   ;;  %v190_v6 = vshrl.u32 %v189_v4, 7  ;;  %s248_s29 = sshll.u32 %s177_s28, 4  ;;  %s246_s4 = scalar_lea.hbm %s696_s2, %s350_s21  ;;  %s249_s29 = int_to_ptr.vmem [resolvable:$true] %s248_s29 }
  0x2d   : > { %v188_v5 = vunpack.c.0.s8 %v187_v3  ;;  %s232_s5 = scalar_lea.sflag [#allocation4], %s639_s18  ;;  %s452_s6 = scalar_lea.vmem %s249_s29, 128 }
  0x2e   : > { %p453_p8 = scmp.ne.s32.totalorder %s249_s29, %s452_s6  ;;  %s537_s7 = smov [#allocation5]  }
  0x2f   : > { %v191_v7 = vsub.s32 %v188_v5, %v190_v6  ;;  %s456_s8 = sshll.u32 %s537_s7, 4  ;;  %s457_s8 = int_to_ptr.vmem [resolvable:$false] %s456_s8 }
  0x30   : > { %p454_p11 = pnand %p453_p8, %p604_p9  ;;  %s458_s12 = scalar_lea.vmem %s457_s8, 256 }
  0x31   : > { %p459_p0 = scmp.lt.s32.totalorder %s249_s29, %s457_s8  ;;  %p460_p1 = scmp.lt.s32.totalorder %s458_s12, %s452_s6 }
  0x32   : > { %p455_p12 = pneg %p454_p11 }
  0x33   : > { %p461_p2 = por %p460_p1, %p459_p0 }
  0x35   : > { %p462_p3 = pnand %p461_p2, %p455_p12 }
  0xa7   : > { %v185_v8 = vpop.permute.xlu0 %184 }
  0xa8   : > { %v192_v10 = vrot.slane %v185_v8, %v191_v7 }
  0xaa   : > { %v194_v11 = vmul.f32 %v192_v10, %v180_v9 }
  0xac   : > { %v196_v12 = vcombine.high %v194_v11, %v194_v11  ;;  %v199_v13 = vsel %vm198_vm0, %v194_v11, 0.0 }
  0xad   : > { %v200_v14 = vrot.slane %v199_v13, 4 }
  0xae   : > { %v206_v15 = vsel %vm198_vm0, %v196_v12, 0.0 }
  0xaf   : > { %v201_v16 = vadd.f32 %v200_v14, %v199_v13  ;;  %v207_v17 = vrot.slane %v206_v15, 4 }
  0xb1   : > { %v202_v18 = vrot.slane %v201_v16, 2  ;;  %v208_v19 = vadd.f32 %v207_v17, %v206_v15 }
  0xb3   : > { %v203_v20 = vadd.f32 %v202_v18, %v201_v16  ;;  %v209_v21 = vrot.slane %v208_v19, 2 }
  0xb5   : > { %v204_v22 = vrot.slane %v203_v20, 1  ;;  %v210_v23 = vadd.f32 %v209_v21, %v208_v19 }
  0xb7   : > { %v205_v24 = vadd.f32 %v204_v22, %v203_v20  ;;  %v211_v25 = vrot.slane %v210_v23, 1 }
  0xb9   : > { %v212_v26 = vadd.f32 %v211_v25, %v210_v23  ;;  %v342_v27 = vmul.f32 -1.442695, %v205_v24 }
  0xbb   : > { %416 = vpow2.f32 %v342_v27  ;;  %v343_v28 = vmul.f32 -1.442695, %v212_v26 }
  0xbd   : > { %418 = vpow2.f32 %v343_v28 }
  0xc8   : > { %v417_v29 = vpop.eup %416 }
  0xc9   : > { %v219_v30 = vadd.f32 1.0, %v417_v29 }
  0xca   : > { %v419_v31 = vpop.eup %418 }
  0xcb   : > { %v220_v32 = vadd.f32 1.0, %v419_v31  ;;  %420 = vrcp.f32 %v219_v30 }
  0xcd   : > { %422 = vrcp.f32 %v220_v32 }
  0xd8   : > { %v421_v33 = vpop.eup %420 }
  0xda   : > { %v423_v34 = vpop.eup %422 }
  0xdb   : > { %v227_v35 = vcombine.low %v421_v33, %v423_v34 }
  0xdd   : > { %v229_v36 = vmul.f32 %v227_v35, %v180_v9 }
  0xdf   : > { %230 = vst [vmem:[%s177_s28] sm:$0xff] %v229_v36 }
  0xe0   : > { %465 = shalt.err (!%p462_p3)
}
  0xe1   : > { %s466_s15 = scalar_lea.hbm %s246_s4, 128  ;;  %s470_s19 = scalar_lea.hbm %s696_s2, 256 }
  0xe2   : > { %p467_p5 = scmp.ne.s32.totalorder %s246_s4, %s466_s15  ;;  %p471_p10 = scmp.lt.s32.totalorder %s246_s4, %s696_s2 }
  0xe3   : > { %p472_p4 = scmp.lt.s32.totalorder %s470_s19, %s466_s15 }
  0xe4   : > { %p468_p6 = pnand %p467_p5, %p604_p9 }
  0xe5   : > { %p473_p13 = por %p472_p4, %p471_p10 }
  0xe6   : > { %p469_p7 = pneg %p468_p6 }
  0xe8   : > { %p474_p8 = pnand %p473_p13, %p469_p7 }
  0xea   : > { %477 = shalt.err (!%p474_p8)
}
  0xeb   : > { %353 = dma.vmem_to_hbm [thread:$0]  (%p604_p9), %s249_s29, 128, %s246_s4, %s232_s5  }
  0xec PF: > { %s260_s26 = sand.u32 1, %s512_s9   ;;  %p702_p11 = scmp.ne.s32.totalorder %s700_s24, 0 }
  0xed   : > { %p703_p12 = scmp.ge.s32.totalorder %s532_s14, 2  ;;  %s261_s27 = scalar_lea.sflag [#allocation4], %s260_s26 }
  0xef   : > { %p360_p0 = pnand %p703_p12, %p702_p11 }
  0xf1   : > { %p361_p1 = pneg %p360_p0 }
  0xf3   : > { %507 = dma.done.wait (%p361_p1), %s261_s27, 128  }
  0xf4   : > { %509 = vsyncadd (%p361_p1), %s261_s27, 4294967168  ;;  %s18_s14 = sadd.s32 1, %s532_s14   ;;  %s704_s9 = smov %s516_s10 }
  0xf5   : > { %p15_p2 = scmp.ge.s32.totalorder %s18_s14, 4   ;;  %s705_s10 = smov %s520_s11 }
  0xf6   : > { %s706_s11 = smov %s609_s23  ;;  %s707_s12 = smov %s528_s13 }
  0xf7   : > { %s708_s13 = smov %s710_s17  ;;  %17 = sbr.rel (!%p15_p2) target bundleno = 6 (0x6), region = 73 }
  0xfc   :  { %266 = vsyncpa [#allocation3], 1 }
  0xfd   :  { %268 = vsyncpa [#allocation3 + $0x1], 1 }
  0xfe   :  { %269 = vsyncpa [#allocation4], 1 }
  0xff   :  { %271 = vsyncpa [#allocation4 + $0x1], 1 }

</bundles_post_ra>
